<compile_context>
chip_gen: v6e
topology: v6e:2x2x1
jax: 0.10.0
libtpu: 0.0.40
codegen_flags: <defaults>
</compile_context>

<pallas_src>
import functools
import math

import jax
import jax.numpy as jnp
from jax.experimental import pallas as pl
from jax.experimental.pallas import tpu as pltpu


def _layernorm_kernel(x_ref, alpha_ref, bias_ref, o_ref, *, eps):
    # One row-tile per grid step.  Reductions over the lane axis go to the XLU,
    # sqrt/reciprocal go to the EUP on a (tm,1) column, and the per-element work
    # is a single mul+add on the VPU.  Compute in f32 regardless of input dtype.
    x = x_ref[...].astype(jnp.float32)                        # (tm, d)
    d = x.shape[-1]
    mean = jnp.mean(x, axis=-1, keepdims=True)                # (tm, 1)
    diff = x - mean
    # torch.Tensor.std defaults to the unbiased estimator (divide by N-1).
    var = jnp.sum(diff * diff, axis=-1, keepdims=True) * (1.0 / (d - 1))
    std = jnp.sqrt(var)                                       # (tm, 1)
    # Fold alpha and the divide into one per-row scale (exact reciprocal so the
    # result matches the torch-style reference within 1e-5).
    inv = pl.reciprocal(std + eps, approx=False)               # (tm, 1)
    scale = alpha_ref[0] * inv                                 # (tm, 1)
    o_ref[...] = (diff * scale + bias_ref[0]).astype(o_ref.dtype)


def _round_up(n, m):
    return ((n + m - 1) // m) * m


def layer_normalization(x, alpha, bias, *, eps=1e-6,
                        block_bytes=2 * 1024 * 1024, min_grid=4):
    """Pallas LayerNormalization over the last axis.

    x: (..., d_model).  alpha, bias: shape-(1,) learnable scalars (as in the
    PyTorch module).  Returns an array of the same shape/dtype as x.
    """
    orig_shape = x.shape
    d = int(orig_shape[-1])
    M = int(math.prod(orig_shape[:-1]))

    itemsize = jnp.dtype(x.dtype).itemsize
    sublane = max(8, 32 // itemsize)            # 8 f32 / 16 bf16 / 32 int8

    # Rows per block from a byte budget: large enough to amortize per-step
    # overhead, small enough that 2x-in + 2x-out pipelined buffers plus f32
    # temps stay comfortably inside the scoped VMEM limit (v7x-safe).
    tm = max(sublane, ((block_bytes // (d * itemsize)) // sublane) * sublane)
    tm = min(tm, _round_up(M, sublane))
    # Keep the grid long enough to shard the parallel row axis across
    # TensorCores (v7x has 2 TCs/chip) when there are enough rows.
    if M >= min_grid * sublane:
        cap = max(sublane, ((M // min_grid) // sublane) * sublane)
        tm = min(tm, cap)

    grid = (pl.cdiv(M, tm),)                    # partial last block is fine:
                                                # per-row LN; OOB rows never stored

    x2 = x.reshape(M, d)                        # leading-dim collapse, no copy
    alpha = jnp.asarray(alpha, jnp.float32).reshape(1)
    bias = jnp.asarray(bias, jnp.float32).reshape(1)

    cost = pl.CostEstimate(
        flops=6 * M * d,
        transcendentals=2 * M,                  # sqrt + reciprocal per row
        bytes_accessed=2 * M * d * itemsize + 8,
    )

    out = pl.pallas_call(
        functools.partial(_layernorm_kernel, eps=float(eps)),
        out_shape=jax.ShapeDtypeStruct((M, d), x.dtype),
        grid_spec=pltpu.PrefetchScalarGridSpec(
            num_scalar_prefetch=0,
            grid=grid,
            in_specs=[
                pl.BlockSpec((tm, d), lambda i: (i, 0)),              # x rows
                pl.BlockSpec(memory_space=pltpu.MemorySpace.SMEM),    # alpha
                pl.BlockSpec(memory_space=pltpu.MemorySpace.SMEM),    # bias
            ],
            out_specs=pl.BlockSpec((tm, d), lambda i: (i, 0)),
        ),
        compiler_params=pltpu.CompilerParams(
            dimension_semantics=("parallel",),
            vmem_limit_bytes=32 * 1024 * 1024,
        ),
        cost_estimate=cost,
    )(x2, alpha, bias)

    return out.reshape(orig_shape)


def decoder_forward(x, encoder_output, src_mask, tgt_mask, layers, alpha, bias,
                    *, eps=1e-6):
    """Decoder.forward: apply each layer, then the final LayerNormalization."""
    # TODO(synk): DecoderBlock internals are not part of this spec; `layers` are
    # opaque caller-provided JAX callables applied as-is (empty in the demo).
    # Longer term, the LN should be fused into the epilogue of the last layer's
    # matmul to save a full HBM round-trip of x.
    for layer in layers:
        x = layer(x, encoder_output, src_mask, tgt_mask)
    return layer_normalization(x, alpha, bias, eps=eps)


if __name__ == "__main__":
    batch, seq, d_model = 2, 8, 128   # lane-dense feature dim (multiple of 128)
    key = jax.random.PRNGKey(0)
    kx, ke = jax.random.split(key)

    x = jax.random.normal(kx, (batch, seq, d_model), jnp.float32)
    encoder_output = jax.random.normal(ke, (batch, seq, d_model), jnp.float32)
    src_mask = jnp.ones((batch, 1, seq, seq), jnp.bool_)
    tgt_mask = jnp.tril(jnp.ones((seq, seq), jnp.bool_))[None, None]

    alpha = jnp.full((1,), 1.25, jnp.float32)   # learnable scalar gain
    bias = jnp.full((1,), -0.5, jnp.float32)    # learnable scalar bias
    eps = 1e-6

    layers = ()   # no DecoderBlock definition in this spec (see TODO above)

    y = decoder_forward(x, encoder_output, src_mask, tgt_mask, layers,
                        alpha, bias, eps=eps)
    y = jax.block_until_ready(y)

    # pure-JAX reference mirroring the PyTorch module exactly
    xr = x
    for layer in layers:
        xr = layer(xr, encoder_output, src_mask, tgt_mask)
    mean = xr.mean(axis=-1, keepdims=True)
    std = jnp.std(xr, axis=-1, ddof=1, keepdims=True)   # torch's unbiased std
    ref = alpha[0] * (xr - mean) / (std + eps) + bias[0]

    assert y.shape == x.shape
    assert jnp.allclose(y, ref, atol=1e-5, rtol=1e-5), "mismatch vs reference"
    print("KERNEL_OK")
</pallas_src>

<mosaic_0001>
module attributes {stable_mosaic.version = 11 : i64} {
  func.func @_layernorm_kernel(%arg0: i32, %arg1: memref<16x128xf32, #tpu.memory_space<vmem>>, %arg2: memref<1xf32, #tpu.memory_space<smem>>, %arg3: memref<1xf32, #tpu.memory_space<smem>>, %arg4: memref<16x128xf32, #tpu.memory_space<vmem>>) attributes {dimension_semantics = [#tpu.dimension_semantics<parallel>], iteration_bounds = array<i64: 1>, scalar_prefetch = 0 : i64, scratch_operands = 0 : i64, tpu.core_type = #tpu.core_type<tc>, window_params = [{transform_indices = @transform_0, window_bounds = array<i64: 16, 128>}, {transform_indices = @transform_1, window_bounds = array<i64: 1>}, {transform_indices = @transform_2, window_bounds = array<i64: 1>}, {transform_indices = @transform_3, window_bounds = array<i64: 16, 128>}]} {
    %c0 = arith.constant 0 : index
    %c0_0 = arith.constant 0 : index
    %0 = vector.load %arg1[%c0, %c0_0] : memref<16x128xf32, #tpu.memory_space<vmem>>, vector<16x128xf32>
    %cst = arith.constant dense<0.000000e+00> : vector<16xf32>
    %1 = vector.multi_reduction <add>, %0, %cst [1] : vector<16x128xf32> to vector<16xf32>
    %2 = vector.shape_cast %1 : vector<16xf32> to vector<16x1xf32>
    %cst_1 = arith.constant 1.280000e+02 : f32
    %3 = vector.broadcast %cst_1 : f32 to vector<16x1xf32>
    %4 = arith.divf %2, %3 : vector<16x1xf32>
    %5 = vector.broadcast %4 : vector<16x1xf32> to vector<16x128xf32>
    %6 = arith.subf %0, %5 : vector<16x128xf32>
    %7 = arith.mulf %6, %6 : vector<16x128xf32>
    %cst_2 = arith.constant dense<0.000000e+00> : vector<16xf32>
    %8 = vector.multi_reduction <add>, %7, %cst_2 [1] : vector<16x128xf32> to vector<16xf32>
    %9 = vector.shape_cast %8 : vector<16xf32> to vector<16x1xf32>
    %cst_3 = arith.constant 0.00787401571 : f32
    %10 = vector.broadcast %cst_3 : f32 to vector<16x1xf32>
    %11 = arith.mulf %9, %10 : vector<16x1xf32>
    %12 = math.sqrt %11 : vector<16x1xf32>
    %cst_4 = arith.constant 9.99999997E-7 : f32
    %13 = vector.broadcast %cst_4 : f32 to vector<16x1xf32>
    %14 = arith.addf %12, %13 : vector<16x1xf32>
    %15 = tpu.reciprocal %14 : vector<16x1xf32> -> vector<16x1xf32>
    %c0_5 = arith.constant 0 : index
    %16 = memref.load %arg2[%c0_5] : memref<1xf32, #tpu.memory_space<smem>>
    %17 = vector.broadcast %16 : f32 to vector<16x1xf32>
    %18 = arith.mulf %17, %15 : vector<16x1xf32>
    %19 = vector.broadcast %18 : vector<16x1xf32> to vector<16x128xf32>
    %20 = arith.mulf %6, %19 : vector<16x128xf32>
    %c0_6 = arith.constant 0 : index
    %21 = memref.load %arg3[%c0_6] : memref<1xf32, #tpu.memory_space<smem>>
    %22 = vector.broadcast %21 : f32 to vector<16x128xf32>
    %23 = arith.addf %20, %22 : vector<16x128xf32>
    %c0_7 = arith.constant 0 : index
    %c0_8 = arith.constant 0 : index
    %24 = vector.load %arg4[%c0_7, %c0_8] : memref<16x128xf32, #tpu.memory_space<vmem>>, vector<16x128xf32>
    tpu.vector_store %arg4[%c0_7, %c0_8], %23 {strides = array<i32>} : memref<16x128xf32, #tpu.memory_space<vmem>>, vector<16x128xf32>,
    return
  }
  func.func @transform_0(%arg0: i32) -> (i32, i32) {
    %c0_i32 = arith.constant 0 : i32
    %c0_i32_0 = arith.constant 0 : i32
    return %arg0, %c0_i32 : i32, i32
  }
  func.func @transform_1(%arg0: i32) -> i32 {
    %c0_i32 = arith.constant 0 : i32
    %c0_i32_0 = arith.constant 0 : i32
    return %c0_i32 : i32
  }
  func.func @transform_2(%arg0: i32) -> i32 {
    %c0_i32 = arith.constant 0 : i32
    %c0_i32_0 = arith.constant 0 : i32
    return %c0_i32 : i32
  }
  func.func @transform_3(%arg0: i32) -> (i32, i32) {
    %c0_i32 = arith.constant 0 : i32
    %c0_i32_0 = arith.constant 0 : i32
    return %arg0, %c0_i32 : i32, i32
  }
}

</mosaic_0001>

<bundles_post_ra>
// kernel: tpu_custom_call.1
= control target key start
LH: loop header
LB: loop body
LE: loop exit
PB: predicated region body
PF: predicated region fallthrough
CT: control target
= control target key end

     0   :  { %10 = vsyncpa [#allocation5], 0  ;;  %s195_s0 = inlined_call_operand.hbm [shape: f32[16,128], index: 0, kind: input, shape index: {}]   ;;  %s196_s1 = inlined_call_operand.<no memory space> [shape: f32[1], index: 1, kind: input, shape index: {}]   ;;  %s197_s2 = inlined_call_operand.<no memory space> [shape: f32[1], index: 2, kind: input, shape index: {}]   ;;  %s198_s3 = inlined_call_operand.hbm [shape: f32[16,128], index: 3, kind: output, shape index: {}]  }
   0x1   :  { %11 = vsyncpa [#allocation6], 0  ;;  %s153_s12 = smov [#allocation4]  }
   0x2   :  { %s17_s13 = sshll.u32 %s153_s12, 4  ;;  %s18_s13 = int_to_ptr.vmem [resolvable:$true] %s17_s13 }
   0x3   :  { %s117_s14 = scalar_lea.vmem %s18_s13, 256  ;;  %p122_p1 = scmp.lt.s32.totalorder %s18_s13, %s18_s13 }
   0x4   :  { %p118_p0 = scmp.ne.s32.totalorder %s18_s13, %s117_s14  ;;  %p123_p2 = scmp.lt.s32.totalorder %s117_s14, %s117_s14 }
   0x6   :  { %p124_p3 = por %p123_p2, %p122_p1 }
   0x8   :  { %p125_p4 = pnand %p124_p3, %p118_p0 }
   0xa   :  { %128 = shalt.err (!%p125_p4)
}
   0xb   :  { %s154_s15 = smov 128   ;;  %s155_s16 = smov 8  }
   0xc   :  { %23 = dma.hbm_to_vmem [thread:$0]  %s195_s0, 256, %s18_s13, [#allocation5], %s154_s15, %s154_s15, %s155_s16  }
   0xd   :  { %149 = dma.done.wait [#allocation5], 256  }
   0xe   :  { %150 = vsyncadd [#allocation5], 4294967040  ;;  %v31_v0 = vld [vmem:[#allocation4] sm:$0xff]  ;;  %v32_v1 = vld [vmem:[#allocation4 + $0x8] sm:$0xff]  ;;  %v69_v26 = vstv %s196_s1  ;;  %v75_v29 = vstv %s197_s2  ;;  %s156_s22 = smov [#allocation7]  }
   0xf   :  { %33 = vadd.xlane.f32.xlu0 %v31_v0  ;;  %s85_s23 = sshll.u32 %s156_s22, 4  ;;  %s86_s23 = int_to_ptr.vmem [resolvable:$true] %s85_s23 }
  0x10   :  { %s129_s24 = scalar_lea.vmem %s86_s23, 256  ;;  %p134_p6 = scmp.lt.s32.totalorder %s86_s23, %s86_s23 }
  0x11   :  { %p130_p5 = scmp.ne.s32.totalorder %s86_s23, %s129_s24  ;;  %p135_p7 = scmp.lt.s32.totalorder %s129_s24, %s129_s24 }
  0x13   :  { %35 = vadd.xlane.f32.xlu0 %v32_v1  ;;  %p136_p8 = por %p135_p7, %p134_p6 }
  0x15   :  { %p137_p9 = pnand %p136_p8, %p130_p5 }
  0x98   :  { %v34_v2 = vpop.xlane.xlu0 %33 }
  0x99   :  { %v38_v3 = vmul.f32 0.0078125, %v34_v2 }
  0x9b   :  { %v40_v4 = vsub.f32 %v31_v0, %v38_v3 }
  0x9c   :  { %v36_v5 = vpop.xlane.xlu0 %35 }
  0x9d   :  { %v39_v6 = vmul.f32 0.0078125, %v36_v5  ;;  %v42_v7 = vmul.f32 %v40_v4, %v40_v4 }
  0x9f   :  { %v41_v8 = vsub.f32 %v32_v1, %v39_v6  ;;  %44 = vadd.xlane.f32.xlu1 %v42_v7 }
  0xa1   :  { %v43_v9 = vmul.f32 %v41_v8, %v41_v8 }
  0xa3   :  { %46 = vadd.xlane.f32.xlu1 %v43_v9 }
 0x128   :  { %v45_v10 = vpop.xlane.xlu1 %44 }
 0x129   :  { %v48_v11 = vmul.f32 0.007874016, %v45_v10 }
 0x12b   :  { %101 = vrsqrt.f32 %v48_v11  ;;  %vm52_vm0 = vcmp.eq.f32.partialorder %v48_v11, inf  ;;  %v55_v16 = vand.u32 2147483648, %v48_v11  ;;  %vm54_vm1 = vcmp.eq.f32.partialorder %v48_v11, 0.0 }
 0x12c   :  { %v47_v12 = vpop.xlane.xlu1 %46 }
 0x12d   :  { %v49_v13 = vmul.f32 0.007874016, %v47_v12 }
 0x12f   :  { %103 = vrsqrt.f32 %v49_v13  ;;  %vm59_vm2 = vcmp.eq.f32.partialorder %v49_v13, inf  ;;  %v62_v22 = vand.u32 2147483648, %v49_v13  ;;  %vm61_vm3 = vcmp.eq.f32.partialorder %v49_v13, 0.0 }
 0x138   :  { %v102_v14 = vpop.eup %101 }
 0x139   :  { %v51_v15 = vmul.f32 %v102_v14, %v48_v11 }
 0x13b   :  { %v53_v17 = vsel %vm52_vm0, %v48_v11, %v51_v15 }
 0x13c   :  { %v104_v18 = vpop.eup %103  ;;  %v56_v19 = vsel %vm54_vm1, %v55_v16, %v53_v17 }
 0x13d   :  { %v64_v20 = vadd.f32 1e-06, %v56_v19  ;;  %v58_v21 = vmul.f32 %v104_v18, %v49_v13 }
 0x13f   :  { %105 = vrcp.f32 %v64_v20  ;;  %v60_v23 = vsel %vm59_vm2, %v49_v13, %v58_v21 }
 0x140   :  { %v63_v24 = vsel %vm61_vm3, %v62_v22, %v60_v23 }
 0x141   :  { %v65_v25 = vadd.f32 1e-06, %v63_v24 }
 0x143   :  { %107 = vrcp.f32 %v65_v25 }
 0x14c   :  { %v106_v27 = vpop.eup %105 }
 0x14d   :  { %v70_v28 = vmul.f32 %v106_v27, %v69_v26 }
 0x14f   :  { %v72_v30 = vmul.f32 %v70_v28, %v40_v4 }
 0x150   :  { %v108_v31 = vpop.eup %107 }
 0x151   :  { %v71_v32 = vmul.f32 %v108_v31, %v69_v26  ;;  %v76_v33 = vadd.f32 %v75_v29, %v72_v30 }
 0x153   :  { %v73_v34 = vmul.f32 %v71_v32, %v41_v8  ;;  %78 = vst [vmem:[#allocation7] sm:$0xff] %v76_v33 }
 0x155   :  { %v77_v35 = vadd.f32 %v75_v29, %v73_v34 }
 0x157   :  { %79 = vst [vmem:[#allocation7 + $0x8] sm:$0xff] %v77_v35 }
 0x158   :  { %140 = shalt.err (!%p137_p9)
}
 0x159   :  { %91 = dma.vmem_to_hbm [thread:$0]  %s86_s23, 256, %s198_s3, [#allocation6], %s154_s15, %s154_s15, %s155_s16  }
 0x15a   :  { %151 = dma.done.wait [#allocation6], 256  }
 0x15b   :  { %152 = vsyncadd [#allocation6], 4294967040 }
 0x15c   :  { %95 = vsyncpa [#allocation5], 1 }
 0x15d   :  { %96 = vsyncpa [#allocation6], 1 }

</bundles_post_ra>
